<compile_context>
chip_gen: v6e
topology: v6e:2x2x1
jax: 0.10.0
libtpu: 0.0.40
codegen_flags: <defaults>
</compile_context>

<pallas_src>
import jax
import jax.numpy as jnp
from jax.experimental import pallas as pl
from jax.experimental.pallas import tpu as pltpu


_CHUNK_BYTES = 4 << 20   # target ~4 MiB per DMA chunk
_MAX_CHUNKS = 8          # a handful of in-flight DMAs is enough for HBM BW


def _make_dma_copy_kernel(num_chunks: int, chunk_rows: int, total_rows: int):
    """Build a kernel copying x -> out with `num_chunks` direct HBM->HBM DMAs."""

    def kernel(x_ref, o_ref, sems):
        # Issue all DMAs back-to-back so several are in flight at once, then
        # wait on each.  Slices are static (Python ints) along the leading
        # axis; src and dst have identical shape/dtype/layout, so each DMA is
        # a straight HBM->HBM burst with zero TensorCore work.
        copies = []
        for c in range(num_chunks):
            if num_chunks == 1:
                cp = pltpu.make_async_copy(x_ref, o_ref, sems.at[c])
            else:
                start = c * chunk_rows
                size = min(chunk_rows, total_rows - start)
                if size <= 0:
                    continue
                cp = pltpu.make_async_copy(
                    x_ref.at[pl.ds(start, size)],
                    o_ref.at[pl.ds(start, size)],
                    sems.at[c],
                )
            cp.start()
            copies.append(cp)
        for cp in copies:
            cp.wait()

    return kernel


def base_template_forward(x: jax.Array, *, skip_copy: bool = False) -> jax.Array:
    """Identity forward pass for BaseTemplate, executed via a Pallas DMA kernel.

    skip_copy=True returns the input directly (zero HBM traffic) for callers
    that do not require a freshly materialized buffer.
    """
    if skip_copy:
        return x

    n = int(x.size)
    if n == 0:
        return x

    itemsize = int(jnp.dtype(x.dtype).itemsize)
    nbytes = n * itemsize
    leading = int(x.shape[0]) if x.ndim >= 1 else 1

    # Chunk only when the tensor is big enough that multiple in-flight DMAs
    # pay off; otherwise a single whole-array DMA (no slicing at all).
    if x.ndim >= 1 and leading > 1 and nbytes >= 2 * _CHUNK_BYTES:
        num_chunks = int(min(_MAX_CHUNKS, leading, pl.cdiv(nbytes, _CHUNK_BYTES)))
    else:
        num_chunks = 1
    chunk_rows = -(-leading // num_chunks)  # ceil division

    kernel = _make_dma_copy_kernel(num_chunks, chunk_rows, leading)

    out = pl.pallas_call(
        kernel,
        out_shape=jax.ShapeDtypeStruct(x.shape, x.dtype),
        in_specs=[pl.BlockSpec(memory_space=pl.ANY)],
        out_specs=pl.BlockSpec(memory_space=pl.ANY),
        scratch_shapes=[pltpu.SemaphoreType.DMA((num_chunks,))],
        compiler_params=pltpu.CompilerParams(has_side_effects=True),
        cost_estimate=pl.CostEstimate(
            flops=0,
            transcendentals=0,
            bytes_accessed=2 * nbytes,
        ),
    )(x)

    return out


if __name__ == "__main__":
    key = jax.random.PRNGKey(0)

    # Small NCHW-style input (batch=2, channels=4, 16x16 spatial).
    x = jax.random.normal(key, (2, 4, 16, 16), dtype=jnp.float32)
    y = jax.block_until_ready(base_template_forward(x))
    assert y.shape == x.shape and y.dtype == x.dtype
    assert bool(jnp.array_equal(y, x))

    # Ragged size (not a multiple of 128) and a packed dtype: the direct
    # HBM->HBM DMA has no lane-dense layout requirement, no special-casing.
    x2 = jax.random.normal(key, (3, 5, 7), dtype=jnp.bfloat16)
    y2 = jax.block_until_ready(base_template_forward(x2))
    assert y2.shape == x2.shape and y2.dtype == x2.dtype
    assert bool(jnp.array_equal(y2, x2))

    # 8 MiB case exercising the multi-chunk (multiple in-flight DMAs) path.
    x3 = jax.random.normal(key, (2048, 1024), dtype=jnp.float32)
    y3 = jax.block_until_ready(base_template_forward(x3))
    assert y3.shape == x3.shape and y3.dtype == x3.dtype
    assert bool(jnp.array_equal(y3, x3))

    print("KERNEL_OK")
</pallas_src>

<mosaic_0001>
module attributes {stable_mosaic.version = 11 : i64} {
  func.func @kernel(%arg0: memref<2x4x16x16xf32, #tpu.memory_space<any>>, %arg1: memref<2x4x16x16xf32, #tpu.memory_space<any>>, %arg2: memref<1x!tpu.dma_semaphore, #tpu.memory_space<semaphore_mem>>) attributes {dimension_semantics = [], scalar_prefetch = 0 : i64, scratch_operands = 1 : i64, tpu.core_type = #tpu.core_type<tc>} {
    %c0_i32 = arith.constant 0 : i32
    %0 = tpu.memref_slice %arg2[%c0_i32] : memref<1x!tpu.dma_semaphore, #tpu.memory_space<semaphore_mem>> -> memref<1x!tpu.dma_semaphore, #tpu.memory_space<semaphore_mem>>
    %1 = tpu.memref_squeeze %0 : memref<1x!tpu.dma_semaphore, #tpu.memory_space<semaphore_mem>> -> memref<!tpu.dma_semaphore, #tpu.memory_space<semaphore_mem>>
    tpu.enqueue_dma source(%arg0 : memref<2x4x16x16xf32, #tpu.memory_space<any>>) target(%arg1 : memref<2x4x16x16xf32, #tpu.memory_space<any>>) target_semaphore(%1 : memref<!tpu.dma_semaphore, #tpu.memory_space<semaphore_mem>>)
    %c0_i32_0 = arith.constant 0 : i32
    %2 = tpu.memref_slice %arg2[%c0_i32_0] : memref<1x!tpu.dma_semaphore, #tpu.memory_space<semaphore_mem>> -> memref<1x!tpu.dma_semaphore, #tpu.memory_space<semaphore_mem>>
    %3 = tpu.memref_squeeze %2 : memref<1x!tpu.dma_semaphore, #tpu.memory_space<semaphore_mem>> -> memref<!tpu.dma_semaphore, #tpu.memory_space<semaphore_mem>>
    tpu.wait_dma2 semaphore(%3 : memref<!tpu.dma_semaphore, #tpu.memory_space<semaphore_mem>>) src(%arg0 : memref<2x4x16x16xf32, #tpu.memory_space<any>>) dst(%arg1 : memref<2x4x16x16xf32, #tpu.memory_space<any>>)
    return
  }
}

</mosaic_0001>

<bundles_post_ra>
// kernel: tpu_custom_call.1
= control target key start
LH: loop header
LB: loop body
LE: loop exit
PB: predicated region body
PF: predicated region fallthrough
CT: control target
= control target key end

     0   :  { %s30_s6 = smov [#allocation2]   ;;  %s31_s7 = smov 131072   ;;  %s49_s0 = inlined_call_operand.hbm [shape: f32[2,4,16,16], index: 0, kind: input, shape index: {}]   ;;  %s50_s1 = inlined_call_operand.hbm [shape: f32[2,4,16,16], index: 1, kind: output, shape index: {}]  }
   0x1   :  { %s32_s8 = smov 0  }
   0x2   :  { %12 = dma.general %s49_s0, 2048, %s50_s1, %s30_s6, %s31_s7, [#allocation4], %s32_s8, 0  }
   0x3   :  { %28 = dma.done.wait [#allocation2], 2048 }
   0x4   :  { %29 = vsyncadd [#allocation2], 4294965248 }
   0x5   :  { %18 = vsyncmov [#allocation2] }
   0x8   :  { %s19_s13 = vpop.sfrf %18 }
   0x9   :  { %p24_p0 = scmp.ne.s32.totalorder %s19_s13, 0 }
   0xb   :  { %23 = shalt.err (%p24_p0)  }

</bundles_post_ra>
